<compile_context>
chip_gen: v6e
topology: v6e:2x2x1
jax: 0.10.0
libtpu: 0.0.40
codegen_flags: <defaults>
</compile_context>

<pallas_src>
import functools

import jax
import jax.numpy as jnp
from jax.experimental import pallas as pl
from jax.experimental.pallas import tpu as pltpu

# ---------------- ResBlock hyper-parameters ----------------
W8 = 0.5          # weight balancing shortcut and branch
KH = KW = 3       # conv kernel size (padding=1 -> same spatial size)
LANE = 128
SUBLANE = 8


def _cdiv(a, b):
    return (a + b - 1) // b


def _round_up(a, b):
    return _cdiv(a, b) * b


def resblock_kernel(x_ref, w_ref, b_ref, o_ref, *, nb, off, sout, taps):
    """Fused 3x3 conv (one MXU dot per frame) + identity + scale + ReLU.

    x_ref: (NB, CP, LF)      bf16 VMEM  - channels on sublanes, zero-padded
                                          flattened frame on lanes (LF % 128 == 0)
    w_ref: (CP, 9*CP)        bf16 VMEM  - tap-major (Cout, 9*Cin) weight matrix
    b_ref: (CP, 1)           f32  VMEM  - conv bias (lane-broadcast in epilogue)
    o_ref: (NB, CP, SOUT)    f32  VMEM  - output frames (SOUT % 128 == 0)
    """
    w2d = w_ref[...]                        # (CP, 9*CP)
    bias = b_ref[...]                       # (CP, 1)
    for f in range(nb):                     # frames in this block (static)
        xf = x_ref[f]                       # (CP, LF) bf16, one lane-dense load
        # im2col-lite: stack the 9 lane-shifted slabs on the sublane axis.
        # (Unaligned lane slices lower to XLU lane shifts, off the VALU path.)
        stacked = jnp.concatenate(
            [xf[:, off + r: off + r + sout] for r in taps], axis=0)  # (9*CP, SOUT)
        # Single MXU matmul per frame: bf16 operands, f32 accumulation.
        acc = jnp.dot(w2d, stacked, preferred_element_type=jnp.float32)
        ident = xf[:, off: off + sout].astype(jnp.float32)   # shortcut (shift 0)
        h2 = (ident + acc + bias) * W8                        # bias folded in
        o_ref[f] = jnp.maximum(h2, 0.0)                       # lane-dense store


def resblock_forward(x, w, b):
    """x: (N, C, H, W) f32, w: (C, C, 3, 3) OIHW f32, b: (C,) f32 -> (N,C,H,W) f32."""
    N, C, H, Wd = x.shape
    assert w.shape[0] == w.shape[1] == C, "Identity shortcut requires Cin == Cout"

    CP = _round_up(max(C, SUBLANE), SUBLANE)     # channels padded to sublane multiple
    Hp, Wp = H + 2, Wd + 2                       # spatially padded frame
    FP = Hp * Wp                                 # flattened padded frame length
    HALO = Wp + 1                                # max |tap shift| in flat coords
    SOUT = _round_up(FP, LANE)                   # lane-dense output slot per frame
    OFF = HALO                                   # frame data offset inside its slot
    LF = _round_up(OFF + SOUT + HALO, LANE)      # lane-dense input slot per frame

    # ---- frames per grid step (NB): VMEM budget / DMA amortization / steps ----
    per_frame_in = CP * LF * 2                   # bf16
    per_frame_out = CP * SOUT * 4                # f32
    per_frame = per_frame_in + per_frame_out
    vmem_frames = max(1, (24 << 20) // (2 * per_frame))    # 2x-buffered, v7x-safe
    dma_frames = max(1, _cdiv(1 << 20, per_frame_in))      # >= ~1 MiB per input DMA
    step_frames = max(1, N // min(N, 16))                  # keep >= ~16 grid steps
    NB = max(1, min(vmem_frames, dma_frames, step_frames))
    G = _cdiv(N, NB)
    NPAD = G * NB

    # ---------------- layout plumbing (no activation transposes) ----------------
    xb = x.astype(jnp.bfloat16)
    xp = jnp.pad(xb, ((0, NPAD - N), (0, CP - C), (1, 1), (1, 1)))   # (NPAD,CP,Hp,Wp)
    xf = jnp.pad(xp.reshape(NPAD, CP, FP),
                 ((0, 0), (0, 0), (OFF, LF - FP - OFF)))             # (NPAD,CP,LF)

    wpad = jnp.pad(w, ((0, CP - C), (0, CP - C), (0, 0), (0, 0)))    # (CP,CP,3,3)
    w2d = jnp.transpose(wpad, (0, 2, 3, 1)).reshape(
        CP, KH * KW * CP).astype(jnp.bfloat16)                       # (CP, 9*CP)
    bp = jnp.pad(b.astype(jnp.float32), (0, CP - C)).reshape(CP, 1)

    taps = tuple((dy - 1) * Wp + (dx - 1) for dy in range(KH) for dx in range(KW))
    kernel = functools.partial(resblock_kernel, nb=NB, off=OFF, sout=SOUT, taps=taps)

    flops = 2 * (KH * KW) * CP * CP * SOUT * NPAD + 5 * CP * SOUT * NPAD
    bytes_accessed = NPAD * CP * (LF * 2 + SOUT * 4) + CP * (KH * KW) * CP * 2 + CP * 4
    block_bytes = NB * per_frame
    vmem_limit = int(min(48 << 20, max(16 << 20, 4 * block_bytes + (2 << 20))))

    out = pl.pallas_call(
        kernel,
        out_shape=jax.ShapeDtypeStruct((NPAD, CP, SOUT), jnp.float32),
        grid=(G,),
        in_specs=[
            pl.BlockSpec((NB, CP, LF), lambda g: (g, 0, 0)),          # activations
            pl.BlockSpec((CP, KH * KW * CP), lambda g: (0, 0)),       # weights (constant block)
            pl.BlockSpec((CP, 1), lambda g: (0, 0)),                  # bias (constant block)
        ],
        out_specs=pl.BlockSpec((NB, CP, SOUT), lambda g: (g, 0, 0)),
        compiler_params=pltpu.CompilerParams(
            dimension_semantics=("parallel",),    # grid steps split across TCs (v7x)
            vmem_limit_bytes=vmem_limit,
        ),
        cost_estimate=pl.CostEstimate(
            flops=flops, transcendentals=0, bytes_accessed=bytes_accessed),
    )(xf, w2d, bp)

    # Crop: drop lane / channel / batch padding plus the conv's spatial border.
    out = out[:N, :C, :FP].reshape(N, C, Hp, Wp)[:, :, 1:1 + H, 1:1 + Wd]
    return out


def resblock_reference(x, w, b):
    conv = jax.lax.conv_general_dilated(
        x, w, window_strides=(1, 1), padding=((1, 1), (1, 1)),
        dimension_numbers=("NCHW", "OIHW", "NCHW"))
    return jnp.maximum((x + conv + b[None, :, None, None]) * W8, 0.0)


if __name__ == "__main__":
    # Small deterministic shapes: batch=2, channels=4, spatial=16x16 (NCHW).
    N, C, H, Wd = 2, 4, 16, 16

    key = jax.random.PRNGKey(0)
    kx, kw, kb = jax.random.split(key, 3)
    x = jax.random.normal(kx, (N, C, H, Wd), dtype=jnp.float32)
    w = jax.random.normal(kw, (C, C, KH, KW), dtype=jnp.float32) * 0.1
    b = jax.random.normal(kb, (C,), dtype=jnp.float32) * 0.1

    out = jax.block_until_ready(resblock_forward(x, w, b))
    ref = resblock_reference(x, w, b)

    assert out.shape == (N, C, H, Wd)
    # bf16 operands on the MXU (per perf review) -> tolerance looser than f32.
    assert jnp.allclose(out, ref, atol=5e-2, rtol=5e-2), "mismatch vs reference"

    print("KERNEL_OK")
</pallas_src>

<mosaic_0001>
module attributes {stable_mosaic.version = 11 : i64} {
  func.func @resblock_kernel(%arg0: i32, %arg1: memref<1x8x512xbf16, #tpu.memory_space<vmem>>, %arg2: memref<8x72xbf16, #tpu.memory_space<vmem>>, %arg3: memref<8x1xf32, #tpu.memory_space<vmem>>, %arg4: memref<1x8x384xf32, #tpu.memory_space<vmem>>) attributes {dimension_semantics = [#tpu.dimension_semantics<parallel>], iteration_bounds = array<i64: 2>, scalar_prefetch = 0 : i64, scratch_operands = 0 : i64, tpu.core_type = #tpu.core_type<tc>, window_params = [{transform_indices = @transform_0, window_bounds = array<i64: 1, 8, 512>}, {pipeline_mode = #tpu.pipeline_mode<synchronous>, transform_indices = @transform_1, window_bounds = array<i64: 8, 72>}, {pipeline_mode = #tpu.pipeline_mode<synchronous>, transform_indices = @transform_2, window_bounds = array<i64: 8, 1>}, {transform_indices = @transform_3, window_bounds = array<i64: 1, 8, 384>}]} {
    %c0 = arith.constant 0 : index
    %c0_0 = arith.constant 0 : index
    %0 = vector.load %arg2[%c0, %c0_0] : memref<8x72xbf16, #tpu.memory_space<vmem>>, vector<8x72xbf16>
    %c0_1 = arith.constant 0 : index
    %c0_2 = arith.constant 0 : index
    %1 = vector.load %arg3[%c0_1, %c0_2] : memref<8x1xf32, #tpu.memory_space<vmem>>, vector<8x1xf32>
    %c0_3 = arith.constant 0 : index
    %c0_4 = arith.constant 0 : index
    %c0_5 = arith.constant 0 : index
    %2 = vector.load %arg1[%c0_3, %c0_4, %c0_5] : memref<1x8x512xbf16, #tpu.memory_space<vmem>>, vector<1x8x512xbf16>
    %3 = vector.shape_cast %2 : vector<1x8x512xbf16> to vector<8x512xbf16>
    %4 = vector.extract_strided_slice %3 {offsets = [0, 0], sizes = [8, 384], strides = [1, 1]} : vector<8x512xbf16> to vector<8x384xbf16>
    %5 = vector.extract_strided_slice %3 {offsets = [0, 1], sizes = [8, 384], strides = [1, 1]} : vector<8x512xbf16> to vector<8x384xbf16>
    %6 = vector.extract_strided_slice %3 {offsets = [0, 2], sizes = [8, 384], strides = [1, 1]} : vector<8x512xbf16> to vector<8x384xbf16>
    %7 = vector.extract_strided_slice %3 {offsets = [0, 18], sizes = [8, 384], strides = [1, 1]} : vector<8x512xbf16> to vector<8x384xbf16>
    %8 = vector.extract_strided_slice %3 {offsets = [0, 19], sizes = [8, 384], strides = [1, 1]} : vector<8x512xbf16> to vector<8x384xbf16>
    %9 = vector.extract_strided_slice %3 {offsets = [0, 20], sizes = [8, 384], strides = [1, 1]} : vector<8x512xbf16> to vector<8x384xbf16>
    %10 = vector.extract_strided_slice %3 {offsets = [0, 36], sizes = [8, 384], strides = [1, 1]} : vector<8x512xbf16> to vector<8x384xbf16>
    %11 = vector.extract_strided_slice %3 {offsets = [0, 37], sizes = [8, 384], strides = [1, 1]} : vector<8x512xbf16> to vector<8x384xbf16>
    %12 = vector.extract_strided_slice %3 {offsets = [0, 38], sizes = [8, 384], strides = [1, 1]} : vector<8x512xbf16> to vector<8x384xbf16>
    %13 = tpu.concatenate %4, %5, %6, %7, %8, %9, %10, %11, %12 in 0 : vector<8x384xbf16>, vector<8x384xbf16>, vector<8x384xbf16>, vector<8x384xbf16>, vector<8x384xbf16>, vector<8x384xbf16>, vector<8x384xbf16>, vector<8x384xbf16>, vector<8x384xbf16> -> vector<72x384xbf16>
    %cst = arith.constant dense<0.000000e+00> : vector<8x384xf32>
    %14 = tpu.matmul %0, %13, %cst {dimension_numbers = #tpu.dot_dimension_numbers<[1], [0], [0], [1], [0, 0, 1, 1], [], []>} : vector<8x72xbf16>, vector<72x384xbf16>, vector<8x384xf32> -> vector<8x384xf32>
    %15 = vector.extract_strided_slice %3 {offsets = [0, 19], sizes = [8, 384], strides = [1, 1]} : vector<8x512xbf16> to vector<8x384xbf16>
    %16 = arith.extf %15 : vector<8x384xbf16> to vector<8x384xf32>
    %17 = arith.addf %16, %14 : vector<8x384xf32>
    %18 = vector.broadcast %1 : vector<8x1xf32> to vector<8x384xf32>
    %19 = arith.addf %17, %18 : vector<8x384xf32>
    %cst_6 = arith.constant 5.000000e-01 : f32
    %20 = vector.broadcast %cst_6 : f32 to vector<8x384xf32>
    %21 = arith.mulf %19, %20 : vector<8x384xf32>
    %cst_7 = arith.constant 0.000000e+00 : f32
    %22 = vector.broadcast %cst_7 : f32 to vector<8x384xf32>
    %23 = arith.maximumf %21, %22 : vector<8x384xf32>
    %c0_8 = arith.constant 0 : index
    %c0_9 = arith.constant 0 : index
    %c0_10 = arith.constant 0 : index
    %24 = vector.load %arg4[%c0_8, %c0_9, %c0_10] : memref<1x8x384xf32, #tpu.memory_space<vmem>>, vector<1x8x384xf32>
    %25 = vector.shape_cast %24 : vector<1x8x384xf32> to vector<8x384xf32>
    %26 = vector.shape_cast %23 : vector<8x384xf32> to vector<1x8x384xf32>
    tpu.vector_store %arg4[%c0_8, %c0_9, %c0_10], %26 {strides = array<i32>} : memref<1x8x384xf32, #tpu.memory_space<vmem>>, vector<1x8x384xf32>,
    return
  }
  func.func @transform_0(%arg0: i32) -> (i32, i32, i32) {
    %c0_i32 = arith.constant 0 : i32
    %c0_i32_0 = arith.constant 0 : i32
    %c0_i32_1 = arith.constant 0 : i32
    return %arg0, %c0_i32, %c0_i32_0 : i32, i32, i32
  }
  func.func @transform_1(%arg0: i32) -> (i32, i32) {
    %c0_i32 = arith.constant 0 : i32
    %c0_i32_0 = arith.constant 0 : i32
    %c0_i32_1 = arith.constant 0 : i32
    return %c0_i32, %c0_i32_0 : i32, i32
  }
  func.func @transform_2(%arg0: i32) -> (i32, i32) {
    %c0_i32 = arith.constant 0 : i32
    %c0_i32_0 = arith.constant 0 : i32
    %c0_i32_1 = arith.constant 0 : i32
    return %c0_i32, %c0_i32_0 : i32, i32
  }
  func.func @transform_3(%arg0: i32) -> (i32, i32, i32) {
    %c0_i32 = arith.constant 0 : i32
    %c0_i32_0 = arith.constant 0 : i32
    %c0_i32_1 = arith.constant 0 : i32
    return %arg0, %c0_i32, %c0_i32_0 : i32, i32, i32
  }
}

</mosaic_0001>

<bundles_post_ra>
// kernel: tpu_custom_call.1
= control target key start
LH: loop header
LB: loop body
LE: loop exit
PB: predicated region body
PF: predicated region fallthrough
CT: control target
= control target key end

     0   :  { %8 = vsyncpa [#allocation3], 0  ;;  %s1065_s0 = inlined_call_operand.hbm [shape: bf16[2,8,512], index: 0, kind: input, shape index: {}]   ;;  %s1066_s1 = inlined_call_operand.vmem [shape: bf16[8,72], index: 1, kind: input, shape index: {}]   ;;  %s1067_s2 = inlined_call_operand.vmem [shape: f32[8,1], index: 2, kind: input, shape index: {}]   ;;  %s1068_s3 = inlined_call_operand.hbm [shape: f32[2,8,384], index: 3, kind: output, shape index: {}]  }
   0x1   :  { %10 = vsyncpa [#allocation3 + $0x1], 0 }
   0x2   :  { %11 = vsyncpa [#allocation4], 0 }
   0x3   :  { %13 = vsyncpa [#allocation4 + $0x1], 0  ;;  %s821_s12 = smov 0   ;;  %s823_s13 = smov 0  }
   0x4   :  { %s825_s14 = smov 0   ;;  %s827_s15 = smov 0  }
   0x5 LB: > { %s842_s16 = sadd.s32 4294967295, %s785_s15   ;;  %s589_s17 = sadd.s32 4294967294, %s785_s15   ;;  %s785_s15 = sphi %s827_s15, %s1085_s15   ;;  %s781_s14 = sphi %s825_s14, %s1084_s14   ;;  %s777_s13 = sphi %s823_s13, %s1083_s13   ;;  %s773_s12 = sphi %s821_s12, %s1082_s12  }
   0x6   : > { %s846_s18 = sadd.s32 1, %s785_s15   ;;  %s26_s19 = sadd.s32 1, %s781_s14 }
   0x7   : > { %s23_s20 = ssub.s32 %s785_s15, %s846_s18  ;;  %p33_p0 = scmp.ne.s32.totalorder %s781_s14, %s777_s13 }
   0x8   : > { %p24_p1 = scmp.eq.s32.totalorder %s23_s20, 0  ;;  %p34_p2 = scmp.eq.s32.totalorder %s785_s15, 0 }
   0x9   : > { %p39_p3 = scmp.ne.s32.totalorder %s777_s13, %s773_s12  ;;  %p40_p4 = scmp.eq.s32.totalorder %s842_s16, 0 }
   0xa   : > { %s858_s21 = scalar_select %p24_p1, %s781_s14, %s26_s19  }
   0xb   : > { %p860_p5 = por %p34_p2, %p33_p0  ;;  %p864_p6 = por %p40_p4, %p39_p3 }
   0xc   : > { %p105_p7 = scmp.eq.s32.totalorder %s842_s16, 1  ;;  %p111_p8 = scmp.eq.s32.totalorder %s589_s17, 1 }
   0xd   : > { %s1072_s23 = scalar_select %p864_p6, 1, 0 }
   0xe   : > { %p642_p10 = scmp.lt.s32.totalorder %s785_s15, 2  ;;  %p871_p11 = por %p105_p7, %p33_p0 }
   0xf   : > { %p875_p12 = por %p111_p8, %p39_p3  ;;  %s137_s26 = sand.u32 1, %s781_s14  }
  0x10   : > { %s1073_s24 = scalar_select %p871_p11, 1, 0 }
  0x11   : > { %s1074_s25 = scalar_select %p875_p12, 1, 0 }
  0x12   : > { %s607_s27 = sshll.u32 %s785_s15, 8  ;;  %s592_s28 = sshll.u32 %s137_s26, 4 }
  0x13   : > { %s884_s4 = scalar_lea.hbm %s1065_s0, %s607_s27  ;;  %s141_s5 = scalar_lea.vmem [#allocation2], %s592_s28 }
  0x14   : > { %s149_s6 = sshll.u32 %s141_s5, 4  ;;  %p888_p13 = pnand %p642_p10, %p860_p5  ;;  %s892_s6 = int_to_ptr.vmem [resolvable:$true] %s149_s6 }
  0x15   : > { %s138_s8 = scalar_lea.sflag [#allocation3], %s137_s26  ;;  %s693_s9 = scalar_lea.hbm %s884_s4, 256 }
  0x16   : > { %p694_p2 = scmp.ne.s32.totalorder %s884_s4, %s693_s9  ;;  %p695_p3 = pneg %p888_p13 }
  0x17   : > { %s698_s17 = scalar_lea.hbm %s1065_s0, 512  ;;  %p699_p5 = scmp.lt.s32.totalorder %s884_s4, %s1065_s0 }
  0x18   : > { %p696_p4 = pnand %p695_p3, %p694_p2  ;;  %p700_p8 = scmp.lt.s32.totalorder %s698_s17, %s693_s9 }
  0x1a   : > { %p697_p7 = pneg %p696_p4  ;;  %p701_p10 = por %p700_p8, %p699_p5 }
  0x1c   : > { %p702_p9 = pnand %p701_p10, %p697_p7 }
  0x1e   : > { %705 = shalt.err (!%p702_p9)
}
  0x1f   : > { %s706_s22 = scalar_lea.vmem %s892_s6, 256  ;;  %s787_s26 = smov [#allocation2]  }
  0x20   : > { %p707_p0 = scmp.ne.s32.totalorder %s892_s6, %s706_s22  ;;  %s711_s27 = sshll.u32 %s787_s26, 4  ;;  %s712_s27 = int_to_ptr.vmem [resolvable:$false] %s711_s27 }
  0x21   : > { %s713_s28 = scalar_lea.vmem %s712_s27, 512  ;;  %p714_p4 = scmp.lt.s32.totalorder %s892_s6, %s712_s27 }
  0x22   : > { %p709_p1 = pnand %p707_p0, %p695_p3  ;;  %p715_p12 = scmp.lt.s32.totalorder %s713_s28, %s706_s22 }
  0x24   : > { %p710_p2 = pneg %p709_p1  ;;  %p716_p11 = por %p715_p12, %p714_p4 }
  0x26   : > { %p717_p6 = pnand %p716_p11, %p710_p2 }
  0x28   : > { %720 = shalt.err (!%p717_p6)
}
  0x29   : > { %637 = dma.hbm_to_vmem [thread:$0]  (!%p888_p13), %s884_s4, 256, %s892_s6, %s138_s8  }
  0x2a   : > { %p1076_p9 = scmp.lt.s32.totalorder %s785_s15, 3  ;;  %p1077_p7 = scmp.ge.s32.totalorder %s785_s15, 1 }
  0x2c   : > { %p155_p0 = pnand %p1077_p7, %p1076_p9 }
  0x2d   : > { %s919_s29 = sand.u32 (!%p155_p0), 1, %s777_s13   ;;  %p1078_p6 = scmp.ne.s32.totalorder (!%p155_p0), %s1072_s23, 0 }
  0x2e   : > { %158 = sbr.rel (%p155_p0) target bundleno = 689 (0x2b1), region = 32  ;;  %s596_s30 = sshll.u32 (!%p155_p0), %s919_s29, 4 }
  0x2f   : > { %s161_s5 = scalar_lea.sflag (!%p155_p0), [#allocation3], %s919_s29  ;;  %s164_s9 = scalar_lea.vmem (!%p155_p0), [#allocation2], %s596_s30 }
  0x33   : > { %764 = dma.done.wait (%p1078_p6), %s161_s5, 256  }
  0x34   : > { %766 = vsyncadd (%p1078_p6), %s161_s5, 4294967040  ;;  %v788_v0 = vmov 0.0   ;;  %v928_v1 = vld [vmem:[%s164_s9 + $0x8] sm:$0xff]  ;;  %v930_v2 = vld [vmem:[%s164_s9] sm:$0xff]  ;;  %s789_s4 = smov 90   ;;  %s790_s23 = smov 92  }
  0x35   : > { %614 = vmatprep.subr.bf16.mxu1 %v788_v0  ;;  %v934_v3 = vcombine.low %v928_v1, %v928_v1  ;;  %v938_v4 = vcombine.low %v930_v2, %v930_v2  ;;  %v600_v5 = vcombine.high %v928_v1, %v928_v1  ;;  %v946_v6 = vcombine.high %v930_v2, %v930_v2  ;;  %s791_s6 = smov 91   ;;  %s792_s7 = smov 109   ;;  %v189_v8 = vld [vmem:[%s1067_s2] sm:$0xff] }
  0x36   : > { %s793_s8 = smov 108   ;;  %s794_s10 = smov 126   ;;  %v796_v7 = vmov 0   ;;  %vm797_vm0 = vmmov 0   ;;  %vm294_vm1 = vcmask 736256   ;;  %vm298_vm2 = vcmask 1043456  }
  0x37   : > { %290 = vrot.lane.b32.xlu1 %v934_v3, %s789_s4  ;;  %286 = vrot.lane.b32.xlu0 %v938_v4, %s789_s4  ;;  %s795_s11 = smov 110   ;;  %s798_s17 = smov 127   ;;  %vm270_vm3 = vcmask 752640   ;;  %vm282_vm4 = vcmask 744448   ;;  %vm246_vm5 = vcmask 891904   ;;  %vm258_vm6 = vcmask 883712  }
  0x38   : > { %392 = vmatprep.mubr.bf16.mxu0 %v796_v7  ;;  %688 = vset.pattern.permute.xlu0 %v796_v7  ;;  %vm222_vm7 = vcmask 1031168   ;;  %vm234_vm8 = vcmask 900096   ;;  %vm210_vm9 = vcmask 1039360   ;;  %vm347_vm10 = vcmask 588800   ;;  %s799_s27 = smov 19   ;;  %s628_s28 = smul.u32 24, %s919_s29 }
  0x39   : > { %624 = vmatprep.mubr.msk.bf16.mxu1 %vm797_vm0, %v788_v0  ;;  %vm454_vm11 = vcmask 154624   ;;  %s629_s30 = smul.u32 384, %s842_s16  ;;  %p1079_p12 = scmp.ne.s32.totalorder %s1073_s24, 0 }
  0x3a   : > { %s186_s5 = scalar_lea.vmem [#allocation5], %s628_s28 }
  0x3b   : > { %292 = vrot.lane.b32.xlu1 %v600_v5, %s789_s4  ;;  %288 = vrot.lane.b32.xlu0 %v946_v6, %s789_s4  ;;  %s519_s9 = sshll.u32 %s186_s5, 4  ;;  %s520_s9 = int_to_ptr.vmem [resolvable:$true] %s519_s9 }
  0x3c   : > { %s721_s16 = scalar_lea.vmem %s520_s9, 384 }
  0x3d   : > { %p722_p11 = scmp.ne.s32.totalorder %s520_s9, %s721_s16 }
  0x3f   : > { %266 = vrot.lane.b32.xlu1 %v934_v3, %s790_s23  ;;  %264 = vrot.lane.b32.xlu0 %v946_v6, %s790_s23  ;;  %p723_p13 = pnand %p722_p11, %p1079_p12 }
  0x41   : > { %p724_p1 = pneg %p723_p13 }
  0x43   : > { %278 = vrot.lane.b32.xlu1 %v934_v3, %s791_s6  ;;  %276 = vrot.lane.b32.xlu0 %v946_v6, %s791_s6 }
  0x47   : > { %274 = vrot.lane.b32.xlu1 %v938_v4, %s791_s6  ;;  %262 = vrot.lane.b32.xlu0 %v938_v4, %s790_s23 }
  0x4b   : > { %280 = vrot.lane.b32.xlu1 %v600_v5, %s791_s6  ;;  %268 = vrot.lane.b32.xlu0 %v600_v5, %s790_s23  ;;  %s1027_s6 = scalar_lea.hbm %s1068_s3, %s629_s30 }
  0x4f   : > { %242 = vrot.lane.b32.xlu1 %v934_v3, %s792_s7  ;;  %240 = vrot.lane.b32.xlu0 %v946_v6, %s792_s7 }
  0x53   : > { %254 = vrot.lane.b32.xlu1 %v934_v3, %s793_s8  ;;  %252 = vrot.lane.b32.xlu0 %v946_v6, %s793_s8 }
  0x57   : > { %250 = vrot.lane.b32.xlu1 %v938_v4, %s793_s8  ;;  %238 = vrot.lane.b32.xlu0 %v938_v4, %s792_s7 }
  0x5b   : > { %256 = vrot.lane.b32.xlu1 %v600_v5, %s793_s8  ;;  %244 = vrot.lane.b32.xlu0 %v600_v5, %s792_s7  ;;  %s800_s8 = smov [#allocation5]  }
  0x5f   : > { %218 = vrot.lane.b32.xlu1 %v934_v3, %s794_s10  ;;  %216 = vrot.lane.b32.xlu0 %v946_v6, %s794_s10 }
  0x63   : > { %230 = vrot.lane.b32.xlu1 %v934_v3, %s795_s11  ;;  %228 = vrot.lane.b32.xlu0 %v946_v6, %s795_s11 }
  0x67   : > { %226 = vrot.lane.b32.xlu1 %v938_v4, %s795_s11  ;;  %214 = vrot.lane.b32.xlu0 %v938_v4, %s794_s10 }
  0x6b   : > { %232 = vrot.lane.b32.xlu1 %v600_v5, %s795_s11  ;;  %220 = vrot.lane.b32.xlu0 %v600_v5, %s794_s10  ;;  %s725_s10 = sshll.u32 %s800_s8, 4  ;;  %s726_s10 = int_to_ptr.vmem [resolvable:$false] %s725_s10 }
  0x6c   : > { %s727_s11 = scalar_lea.vmem %s726_s10, 768  ;;  %p728_p3 = scmp.lt.s32.totalorder %s520_s9, %s726_s10 }
  0x6d   : > { %p729_p5 = scmp.lt.s32.totalorder %s727_s11, %s721_s16 }
  0x6f   : > { %206 = vrot.lane.b32.xlu1 %v934_v3, %s798_s17  ;;  %204 = vrot.lane.b32.xlu0 %v946_v6, %s798_s17  ;;  %p730_p8 = por %p729_p5, %p728_p3 }
  0x71   : > { %p731_p10 = pnand %p730_p8, %p724_p1 }
  0x73   : > { %208 = vrot.lane.b32.xlu1 %v600_v5, %s798_s17  ;;  %202 = vrot.lane.b32.xlu0 %v938_v4, %s798_s17 }
  0x77   : > { %467 = vperm.xlu0 %688, %v189_v8  }
  0xa9   : > { %v291_v9 = vpop.permute.xlu1 %290  ;;  %v287_v10 = vpop.permute.xlu0 %286 }
  0xad   : > { %v293_v11 = vpop.permute.xlu1 %292  ;;  %v289_v12 = vpop.permute.xlu0 %288 }
  0xae   : > { %v296_v13 = vsel %vm294_vm1, %v289_v12, %v291_v9  ;;  %v295_v14 = vsel %vm294_vm1, %v287_v10, %v289_v12  ;;  %v297_v15 = vsel %vm294_vm1, %v291_v9, %v293_v11 }
  0xaf   : > { %601 = vmatprep.subr.msk.bf16.mxu0 %vm298_vm2, %v296_v13  ;;  %v352_v16 = vsel %vm298_vm2, %v295_v14, 0  ;;  %v358_v17 = vsel %vm298_vm2, %v297_v15, 0 }
  0xb0   : > { %367 = vmatpush1.bf16.msra.mxu0 %v352_v16  ;;  %615 = vmatpush3.bf16.msra.mxu1 %v358_v17 }
  0xb1   : > { %v267_v18 = vpop.permute.xlu1 %266  ;;  %v265_v19 = vpop.permute.xlu0 %264  ;;  %616 = vmatprep.subr.bf16.mxu1 %v788_v0 }
  0xb2   : > { %v272_v22 = vsel %vm270_vm3, %v265_v19, %v267_v18 }
  0xb5   : > { %v279_v20 = vpop.permute.xlu1 %278  ;;  %v277_v21 = vpop.permute.xlu0 %276 }
  0xb6   : > { %v284_v23 = vsel %vm282_vm4, %v277_v21, %v279_v20 }
  0xb7   : > { %v341_v24 = vsel %vm298_vm2, %v272_v22, %v284_v23 }
  0xb8   : > { %368 = vmatprep.subr.bf16.mxu0 %v341_v24 }
  0xb9   : > { %v275_v25 = vpop.permute.xlu1 %274  ;;  %v263_v26 = vpop.permute.xlu0 %262 }
  0xba   : > { %v283_v27 = vsel %vm282_vm4, %v275_v25, %v277_v21  ;;  %v271_v28 = vsel %vm270_vm3, %v263_v26, %v265_v19 }
  0xbb   : > { %v337_v29 = vsel %vm298_vm2, %v271_v28, %v283_v27  ;;  %v441_v27 = vunpack.c.l.bf16 %v930_v2 }
  0xbc   : > { %369 = vmatpush1.bf16.msra.mxu0 %v337_v29  ;;  %v444_v29 = vunpack.c.h.bf16 %v928_v1 }
  0xbd   : > { %v281_v30 = vpop.permute.xlu1 %280  ;;  %v269_v31 = vpop.permute.xlu0 %268 }
  0xbe   : > { %v285_v32 = vsel %vm282_vm4, %v279_v20, %v281_v30  ;;  %v273_v33 = vsel %vm270_vm3, %v267_v18, %v269_v31 }
  0xbf   : > { %v345_v34 = vsel %vm298_vm2, %v273_v33, %v285_v32  ;;  %v442_v32 = vunpack.c.h.bf16 %v930_v2  ;;  %v443_v33 = vunpack.c.l.bf16 %v928_v1 }
  0xc0   : > { %617 = vmatpush3.bf16.msra.mxu1 %v345_v34 }
  0xc1   : > { %v243_v35 = vpop.permute.xlu1 %242  ;;  %v241_v36 = vpop.permute.xlu0 %240  ;;  %618 = vmatprep.subr.bf16.mxu1 %v788_v0 }
  0xc2   : > { %v248_v39 = vsel %vm246_vm5, %v241_v36, %v243_v35 }
  0xc5   : > { %v255_v37 = vpop.permute.xlu1 %254  ;;  %v253_v38 = vpop.permute.xlu0 %252 }
  0xc6   : > { %v260_v40 = vsel %vm258_vm6, %v253_v38, %v255_v37 }
  0xc7   : > { %v329_v41 = vsel %vm298_vm2, %v248_v39, %v260_v40 }
  0xc8   : > { %370 = vmatprep.subr.bf16.mxu0 %v329_v41 }
  0xc9   : > { %v251_v42 = vpop.permute.xlu1 %250  ;;  %v239_v43 = vpop.permute.xlu0 %238 }
  0xca   : > { %v259_v44 = vsel %vm258_vm6, %v251_v42, %v253_v38  ;;  %v247_v45 = vsel %vm246_vm5, %v239_v43, %v241_v36 }
  0xcb   : > { %v325_v46 = vsel %vm298_vm2, %v247_v45, %v259_v44 }
  0xcc   : > { %371 = vmatpush1.bf16.msra.mxu0 %v325_v46 }
  0xcd   : > { %v257_v47 = vpop.permute.xlu1 %256  ;;  %v245_v48 = vpop.permute.xlu0 %244 }
  0xce   : > { %v261_v49 = vsel %vm258_vm6, %v255_v37, %v257_v47  ;;  %v249_v50 = vsel %vm246_vm5, %v243_v35, %v245_v48 }
  0xcf   : > { %v333_v51 = vsel %vm298_vm2, %v249_v50, %v261_v49 }
  0xd0   : > { %619 = vmatpush3.bf16.msra.mxu1 %v333_v51 }
  0xd1   : > { %v219_v52 = vpop.permute.xlu1 %218  ;;  %v217_v53 = vpop.permute.xlu0 %216  ;;  %620 = vmatprep.subr.bf16.mxu1 %v788_v0 }
  0xd2   : > { %v224_v56 = vsel %vm222_vm7, %v217_v53, %v219_v52 }
  0xd5   : > { %v231_v54 = vpop.permute.xlu1 %230  ;;  %v229_v55 = vpop.permute.xlu0 %228 }
  0xd6   : > { %v236_v57 = vsel %vm234_vm8, %v229_v55, %v231_v54 }
  0xd7   : > { %v317_v58 = vsel %vm298_vm2, %v224_v56, %v236_v57 }
  0xd8   : > { %372 = vmatprep.subr.bf16.mxu0 %v317_v58 }
  0xd9   : > { %v227_v59 = vpop.permute.xlu1 %226  ;;  %v215_v60 = vpop.permute.xlu0 %214 }
  0xda   : > { %v235_v61 = vsel %vm234_vm8, %v227_v59, %v229_v55  ;;  %v223_v62 = vsel %vm222_vm7, %v215_v60, %v217_v53 }
  0xdb   : > { %v313_v63 = vsel %vm298_vm2, %v223_v62, %v235_v61 }
  0xdc   : > { %373 = vmatpush1.bf16.msra.mxu0 %v313_v63 }
  0xdd   : > { %v233_v5 = vpop.permute.xlu1 %232  ;;  %v221_v7 = vpop.permute.xlu0 %220 }
  0xde   : > { %v237_v8 = vsel %vm234_vm8, %v231_v54, %v233_v5  ;;  %v225_v9 = vsel %vm222_vm7, %v219_v52, %v221_v7 }
  0xdf   : > { %v321_v10 = vsel %vm298_vm2, %v225_v9, %v237_v8 }
  0xe0   : > { %621 = vmatpush3.bf16.msra.mxu1 %v321_v10 }
  0xe1   : > { %v207_v11 = vpop.permute.xlu1 %206  ;;  %v205_v12 = vpop.permute.xlu0 %204  ;;  %622 = vmatprep.subr.bf16.mxu1 %v788_v0  ;;  %v188_v0 = vld [vmem:[%s1066_s1] sm:$0xf] }
  0xe2   : > { %v212_v13 = vsel %vm210_vm9, %v205_v12, %v207_v11 }
  0xe3   : > { %v305_v14 = vsel %vm298_vm2, %v946_v6, %v212_v13 }
  0xe4   : > { %374 = vmatprep.subr.bf16.mxu0 %v305_v14 }
  0xe5   : > { %v209_v15 = vpop.permute.xlu1 %208  ;;  %v203_v16 = vpop.permute.xlu0 %202 }
  0xe6   : > { %v213_v17 = vsel %vm210_vm9, %v207_v11, %v209_v15  ;;  %v211_v18 = vsel %vm210_vm9, %v203_v16, %v205_v12 }
  0xe7   : > { %v301_v19 = vsel %vm298_vm2, %v938_v4, %v211_v18  ;;  %v309_v20 = vsel %vm298_vm2, %v934_v3, %v213_v17 }
  0xe8   : > { %375 = vmatpush1.bf16.msra.mxu0 %v301_v19  ;;  %623 = vmatpush3.bf16.msra.mxu1 %v309_v20 }
  0xeb   : > { %602 = vmatmul.mubr.msk.bf16.vlgmr.msra.gmra.mxu0 %vm347_vm10, %v188_v0  ;;  %625 = vmatmul.mubr.msk.bf16.vlgmr.msra.gmra.mxu1 %vm347_vm10, %v188_v0 }
  0xf2   : > { %v468_v26 = vpop.permute.xlu0 %467 }
 0x1ab   : > { %v394_v6 = vpop.f32.mrf.mxu0  ;;  %v435_v21 = vpop.f32.mrf.mxu1 }
 0x1ac   : > { %448 = vrot.lane.b32.xlu1 %v394_v6, %s799_s27  ;;  %452 = vrot.lane.b32.xlu0 %v435_v21, %s799_s27 }
 0x1ad   : > { %v396_v22 = vpop.f32.mrf.mxu0  ;;  %v626_v23 = vpop.f32.mrf.mxu1 }
 0x1af   : > { %v398_v4 = vpop.f32.mrf.mxu0  ;;  %v438_v24 = vpop.f32.mrf.mxu1 }
 0x1b0   : > { %450 = vrot.lane.b32.xlu1 %v396_v22, %s799_s27 }
 0x1b1   : > { %v399_v3 = vpop.f32.mrf.mxu0  ;;  %v627_v25 = vpop.f32.mrf.mxu1 }
 0x21e   : > { %v449_v28 = vpop.permute.xlu1 %448  ;;  %v453_v31 = vpop.permute.xlu0 %452 }
 0x21f   : > { %v461_v30 = vadd.f32 %v449_v28, %v441_v27  ;;  %v464_v35 = vadd.f32 %v453_v31, %v444_v29 }
 0x221   : > { %v470_v34 = vadd.f32 %v468_v26, %v461_v30  ;;  %v473_v43 = vadd.f32 %v468_v26, %v464_v35 }
 0x222   : > { %v451_v36 = vpop.permute.xlu1 %450 }
 0x223   : > { %v474_v37 = vmul.f32 0.5, %v470_v34  ;;  %v455_v38 = vsel %vm454_vm11, %v449_v28, %v451_v36  ;;  %v456_v39 = vsel %vm454_vm11, %v451_v36, %v453_v31  ;;  %v477_v1 = vmul.f32 0.5, %v473_v43 }
 0x224   : > { %v462_v40 = vadd.f32 %v455_v38, %v442_v32  ;;  %v463_v41 = vadd.f32 %v456_v39, %v443_v33 }
 0x225   : > { %v478_v42 = vmax.f32 %v474_v37, 0.0  ;;  %v481_v49 = vmax.f32 %v477_v1, 0.0 }
 0x226   : > { %v471_v44 = vadd.f32 %v468_v26, %v462_v40  ;;  %v472_v45 = vadd.f32 %v468_v26, %v463_v41 }
 0x227   : > { %486 = vrot.lane.b32.xlu1 %v478_v42, %s792_s7 }
 0x228   : > { %v476_v2 = vmul.f32 0.5, %v472_v45  ;;  %v475_v46 = vmul.f32 0.5, %v471_v44 }
 0x22a   : > { %v480_v47 = vmax.f32 %v476_v2, 0.0  ;;  %v479_v48 = vmax.f32 %v475_v46, 0.0 }
 0x22c   : > { %490 = vrot.lane.b32.xlu1 %v480_v47, %s792_s7  ;;  %488 = vrot.lane.b32.xlu0 %v479_v48, %s792_s7 }
 0x230   : > { %492 = vrot.lane.b32.xlu0 %v481_v49, %s792_s7  ;;  %s505_s7 = scalar_lea.sflag [#allocation4], %s919_s29 }
 0x299   : > { %v487_v50 = vpop.permute.xlu1 %486 }
 0x29e   : > { %v489_v51 = vpop.permute.xlu0 %488  ;;  %v491_v52 = vpop.permute.xlu1 %490 }
 0x29f   : > { %v495_v53 = vsel %vm246_vm5, %v487_v50, %v489_v51  ;;  %v496_v54 = vsel %vm246_vm5, %v489_v51, %v491_v52 }
 0x2a0   : > { %501 = vst [vmem:[%s186_s5] sm:$0xff] %v495_v53  ;;  %502 = vst [vmem:[%s186_s5 + $0x8] sm:$0xff] %v496_v54 }
 0x2a2   : > { %v493_v55 = vpop.permute.xlu0 %492 }
 0x2a3   : > { %v497_v56 = vsel %vm246_vm5, %v491_v52, %v493_v55 }
 0x2a4   : > { %503 = vst [vmem:[%s186_s5 + $0x10] sm:$0xff] %v497_v56 }
 0x2a5   : > { %734 = shalt.err (!%p731_p10)
}
 0x2a6   : > { %s735_s17 = scalar_lea.hbm %s1027_s6, 384  ;;  %s739_s20 = scalar_lea.hbm %s1068_s3, 768 }
 0x2a7   : > { %p736_p2 = scmp.ne.s32.totalorder %s1027_s6, %s735_s17  ;;  %p740_p7 = scmp.lt.s32.totalorder %s1027_s6, %s1068_s3 }
 0x2a8   : > { %p741_p0 = scmp.lt.s32.totalorder %s739_s20, %s735_s17 }
 0x2a9   : > { %p737_p4 = pnand %p736_p2, %p1079_p12 }
 0x2aa   : > { %p742_p6 = por %p741_p0, %p740_p7 }
 0x2ab   : > { %p738_p9 = pneg %p737_p4 }
 0x2ad   : > { %p743_p11 = pnand %p742_p6, %p738_p9 }
 0x2af   : > { %746 = shalt.err (!%p743_p11)
}
 0x2b0   : > { %632 = dma.vmem_to_hbm [thread:$0]  (%p1079_p12), %s520_s9, 384, %s1027_s6, %s505_s7  }
 0x2b1 PF: > { %s531_s27 = sand.u32 1, %s773_s12   ;;  %p1080_p13 = scmp.ne.s32.totalorder %s1074_s25, 0 }
 0x2b2   : > { %p1081_p1 = scmp.ge.s32.totalorder %s785_s15, 2  ;;  %s532_s28 = scalar_lea.sflag [#allocation4], %s531_s27 }
 0x2b4   : > { %p639_p3 = pnand %p1081_p1, %p1080_p13 }
 0x2b6   : > { %p640_p5 = pneg %p639_p3 }
 0x2b8   : > { %768 = dma.done.wait (%p640_p5), %s532_s28, 384  }
 0x2b9   : > { %770 = vsyncadd (%p640_p5), %s532_s28, 4294966912  ;;  %p16_p8 = scmp.ge.s32.totalorder %s846_s18, 4   ;;  %s1082_s12 = smov %s777_s13 }
 0x2ba   : > { %s1083_s13 = smov %s781_s14  ;;  %s1084_s14 = smov %s858_s21 }
 0x2bb   : > { %s1085_s15 = smov %s846_s18  ;;  %18 = sbr.rel (!%p16_p8) target bundleno = 5 (0x5), region = 77 }
 0x2c0   :  { %537 = vsyncpa [#allocation3], 1 }
 0x2c1   :  { %539 = vsyncpa [#allocation3 + $0x1], 1 }
 0x2c2   :  { %540 = vsyncpa [#allocation4], 1 }
 0x2c3   :  { %542 = vsyncpa [#allocation4 + $0x1], 1 }

</bundles_post_ra>
